<compile_context>
chip_gen: v5e
topology: v5e:2x2
jax: 0.10.0
libtpu: 0.0.40
codegen_flags: <defaults>
</compile_context>

<pallas_src>
import functools

import jax
import jax.numpy as jnp
from jax.experimental import pallas as pl
from jax.experimental.pallas import tpu as pltpu


def _attn_pool_kernel(x_ref, wt_ref, o_ref, *,
                      pool_size, n_pool, remainder, tile_g, approx_recip):
    """x_ref: (pool_size, tile_g, D); wt_ref: (D, D) = W^T; o_ref: (tile_g, D)."""
    d = wt_ref.shape[1]

    # One fused MXU matmul over all pool slots. Collapsing the leading axes is
    # sublane-tile aligned (tile_g % 16 == 0) so the reshape is layout-free.
    x2d = x_ref[...].reshape(pool_size * tile_g, d)
    logits_all = jnp.dot(x2d, wt_ref[...], preferred_element_type=jnp.float32)
    xs = [x2d[k * tile_g:(k + 1) * tile_g, :] for k in range(pool_size)]
    logits = [logits_all[k * tile_g:(k + 1) * tile_g, :] for k in range(pool_size)]

    if remainder > 0:
        # Only the last pooling window of each batch holds padded positions,
        # and only its trailing `remainder` slots: rebuild that mask in-kernel
        # from static shape constants (no extra mask stream from HBM).
        i = pl.program_id(0)
        row = jax.lax.broadcasted_iota(jnp.int32, (tile_g, 1), 0) + i * tile_g
        is_last_window = (row % n_pool) == (n_pool - 1)
        mask_value = jnp.float32(-jnp.finfo(jnp.float32).max)
        for k in range(pool_size - remainder, pool_size):
            logits[k] = jnp.where(is_last_window, mask_value, logits[k])

    if pool_size == 2:
        # softmax over two slots == sigmoid(l0 - l1); stable manual form using
        # a single exp and an EUP reciprocal on a denominator in [1, 2].
        diff = logits[0] - logits[1]
        e = jnp.exp(-jnp.abs(diff))
        small = e * pl.reciprocal(1.0 + e, approx=approx_recip)
        a0 = jnp.where(diff >= 0, 1.0 - small, small)
        acc = a0 * xs[0].astype(jnp.float32) + (1.0 - a0) * xs[1].astype(jnp.float32)
        o_ref[...] = acc.astype(o_ref.dtype)
    else:
        # General pool_size: numerically stable softmax over the pool axis,
        # slot-by-slot (pure full-vreg VPU ops, no cross-lane work).
        m = logits[0]
        for k in range(1, pool_size):
            m = jnp.maximum(m, logits[k])
        es = [jnp.exp(l - m) for l in logits]
        denom = es[0]
        for e in es[1:]:
            denom = denom + e
        inv = pl.reciprocal(denom, approx=approx_recip)   # EUP slot when approx=True
        acc = es[0] * xs[0].astype(jnp.float32)
        for k in range(1, pool_size):
            acc = acc + es[k] * xs[k].astype(jnp.float32)
        o_ref[...] = (acc * inv).astype(o_ref.dtype)


def _vmem_limit_bytes():
    """Per-generation scoped-VMEM limit: ~3/4 of physical VMEM
    (v5e/v6e 128 MiB -> 96 MiB, v7x 64 MiB -> 48 MiB); conservative 48 MiB
    fallback if the hardware query is unavailable."""
    cap = 64 * 1024 * 1024
    try:
        cap = int(pltpu.get_tpu_info().vmem_capacity_bytes)
    except Exception:
        pass
    return min((cap * 3) // 4, 100 * 1024 * 1024)


def _pick_tile_g(m_g, d_pad, pool_size, elt_bytes, out_bytes, vmem_budget):
    """Largest row tile (multiple of 16) whose double-buffered BlockSpec tiles
    PLUS the kernel-live f32 intermediates fit the scoped-VMEM budget."""
    m_g16 = ((m_g + 15) // 16) * 16
    for cand in (2048, 1024, 512, 256, 128, 64, 32, 16):
        if cand > m_g16 and cand != 16:
            continue
        x_blocks = 2 * pool_size * cand * d_pad * elt_bytes   # x (double-buffered)
        w_blocks = 2 * d_pad * d_pad * elt_bytes              # W^T (double-buffered)
        o_blocks = 2 * cand * d_pad * out_bytes               # out (double-buffered)
        # f32 logits for every slot + f32 copies of x for the weighted sum
        # + attention / accumulator slabs (conservative upper bound).
        live_f32 = (2 * pool_size + 3) * cand * d_pad * 4
        if x_blocks + w_blocks + o_blocks + live_f32 <= vmem_budget:
            return cand
    return 16


def attention_pool(x, w, pool_size=2, *, compute_dtype=jnp.bfloat16, tile_g=None):
    """x: (b, d, n); w: (d, d) = squeezed Conv2d(dim, dim, 1, bias=False) weight."""
    b, d, n = x.shape
    remainder = n % pool_size
    n_pad = n + remainder          # the reference module pads by `remainder`
    assert n_pad % pool_size == 0, \
        "padded length must divide pool_size (same restriction as the reference module)"
    n_pool = n_pad // pool_size
    m_g = b * n_pool               # total number of pooling windows

    # Lane-dense channel dim (multiple of 128). NOTE: for tiny channel counts
    # (d << 128) this does redundant MXU / writeback work; the kernel's sweet
    # spot is d >= 512 (Enformer uses d = 1536) — leave tiny-d cases to XLA.
    d_pad = max(128, ((d + 127) // 128) * 128)

    elt_bytes = jnp.dtype(compute_dtype).itemsize
    out_dtype = compute_dtype      # bf16 path emits bf16: halves writeback DMA
    out_bytes = jnp.dtype(out_dtype).itemsize

    vmem_limit = _vmem_limit_bytes()
    if tile_g is None:
        tile_g = _pick_tile_g(m_g, d_pad, pool_size, elt_bytes, out_bytes,
                              vmem_budget=int(vmem_limit * 0.9))
        # v7x has two TensorCores: prefer >= 2 'parallel' grid steps over one
        # maximum-size tile so the grid can be sharded across both cores.
        while tile_g >= 32 and -(-m_g // tile_g) < 2:
            tile_g //= 2
    assert tile_g % 16 == 0
    m_g_pad = ((m_g + tile_g - 1) // tile_g) * tile_g   # pad rows instead of tile=M

    # Relayout in compute_dtype (bf16 by default): halves the HBM<->HBM traffic
    # of the pad / reshape / transpose pass vs doing it in f32.
    # (Note: the bf16 path quantizes x itself before the weighted sum; keep
    #  compute_dtype=f32 if f32-accurate pooling values are required.)
    xp = jnp.pad(x.astype(compute_dtype), ((0, 0), (0, d_pad - d), (0, remainder)))
    xk = xp.reshape(b, d_pad, n_pool, pool_size)
    xk = jnp.transpose(xk, (3, 0, 2, 1)).reshape(pool_size, m_g, d_pad)
    if m_g_pad > m_g:
        xk = jnp.pad(xk, ((0, 0), (0, m_g_pad - m_g), (0, 0)))

    # 1x1 conv weight: transposed + channel-padded so the conv is `x @ W^T`.
    wt = jnp.pad(jnp.asarray(w).astype(compute_dtype).T,
                 ((0, d_pad - d), (0, d_pad - d)))

    grid = (m_g_pad // tile_g,)
    kernel = functools.partial(
        _attn_pool_kernel, pool_size=pool_size, n_pool=n_pool,
        remainder=remainder, tile_g=tile_g,
        approx_recip=(jnp.dtype(compute_dtype) != jnp.dtype(jnp.float32)))

    out = pl.pallas_call(
        kernel,
        out_shape=jax.ShapeDtypeStruct((m_g_pad, d_pad), out_dtype),
        grid_spec=pltpu.PrefetchScalarGridSpec(
            num_scalar_prefetch=0,
            grid=grid,
            in_specs=[
                pl.BlockSpec((pool_size, tile_g, d_pad), lambda i: (0, i, 0)),
                # W^T is grid-invariant (constant index_map): fetched once and
                # kept resident in VMEM across the whole grid.
                pl.BlockSpec((d_pad, d_pad), lambda i: (0, 0)),
            ],
            out_specs=pl.BlockSpec((tile_g, d_pad), lambda i: (i, 0)),
        ),
        compiler_params=pltpu.CompilerParams(
            dimension_semantics=("parallel",),
            vmem_limit_bytes=vmem_limit),
    )(xk, wt)

    # (m_g_pad, d_pad) -> (b, d, n_pool); transpose kept for interface fidelity.
    out = out[:m_g, :d].reshape(b, n_pool, d)
    return jnp.transpose(out, (0, 2, 1))


def attention_pool_ref(x, w, pool_size=2):
    """Pure-JAX reference matching the PyTorch forward exactly (f32)."""
    b, d, n = x.shape
    remainder = n % pool_size
    needs_padding = remainder > 0
    if needs_padding:
        x = jnp.pad(x, ((0, 0), (0, 0), (0, remainder)))
    n_pad = n + remainder
    xp = x.reshape(b, d, n_pad // pool_size, pool_size)
    logits = jnp.einsum('oi,binp->bonp', w, xp)
    if needs_padding:
        m = jnp.concatenate([jnp.zeros((n,), bool), jnp.ones((remainder,), bool)])
        m = m.reshape(1, 1, n_pad // pool_size, pool_size)
        logits = jnp.where(m, -jnp.finfo(logits.dtype).max, logits)
    attn = jax.nn.softmax(logits, axis=-1)
    return jnp.sum(xp * attn, axis=-1)


if __name__ == "__main__":
    key = jax.random.PRNGKey(0)
    k_x, k_w, k_x2 = jax.random.split(key, 3)

    b, dim, n, pool_size = 2, 32, 16, 2
    x = jax.random.normal(k_x, (b, dim, n), dtype=jnp.float32)
    # deterministic Conv2d(dim, dim, 1, bias=False) weight, squeezed to (dim, dim)
    w = jax.random.normal(k_w, (dim, dim), dtype=jnp.float32) / jnp.sqrt(dim)

    # f32 precision path (pool_size==2 sigmoid fast path): tight match vs reference.
    out = jax.block_until_ready(
        attention_pool(x, w, pool_size, compute_dtype=jnp.float32))
    ref = attention_pool_ref(x, w, pool_size)
    assert out.shape == (b, dim, n // pool_size)
    assert jnp.allclose(out, ref, atol=2e-5, rtol=2e-5), "mismatch (f32, even n)"

    # padding + in-kernel mask path (odd sequence length).
    x2 = jax.random.normal(k_x2, (b, dim, 15), dtype=jnp.float32)
    out2 = jax.block_until_ready(
        attention_pool(x2, w, pool_size, compute_dtype=jnp.float32))
    ref2 = attention_pool_ref(x2, w, pool_size)
    assert out2.shape == (b, dim, 8)
    assert jnp.allclose(out2, ref2, atol=2e-5, rtol=2e-5), "mismatch (f32, padded n)"

    # general pool_size path (full softmax branch), pool_size == 4, f32.
    out4 = jax.block_until_ready(
        attention_pool(x, w, pool_size=4, compute_dtype=jnp.float32))
    ref4 = attention_pool_ref(x, w, pool_size=4)
    assert out4.shape == (b, dim, n // 4)
    assert jnp.allclose(out4, ref4, atol=2e-5, rtol=2e-5), "mismatch (f32, pool=4)"

    # default bf16 fast path (MXU-native, bf16 relayout + bf16 output).
    out_bf = jax.block_until_ready(attention_pool(x, w, pool_size))
    assert out_bf.dtype == jnp.bfloat16
    assert jnp.allclose(out_bf.astype(jnp.float32), ref, atol=5e-2, rtol=5e-2), \
        "mismatch (bf16, even n)"
    out2_bf = jax.block_until_ready(attention_pool(x2, w, pool_size))
    assert jnp.allclose(out2_bf.astype(jnp.float32), ref2, atol=5e-2, rtol=5e-2), \
        "mismatch (bf16, padded n)"

    print("KERNEL_OK")
</pallas_src>

<mosaic_0001>
module attributes {stable_mosaic.version = 11 : i64} {
  func.func @_attn_pool_kernel(%arg0: i32, %arg1: memref<2x16x128xf32, #tpu.memory_space<vmem>>, %arg2: memref<128x128xf32, #tpu.memory_space<vmem>>, %arg3: memref<16x128xf32, #tpu.memory_space<vmem>>) attributes {dimension_semantics = [#tpu.dimension_semantics<parallel>], iteration_bounds = array<i64: 1>, scalar_prefetch = 0 : i64, scratch_operands = 0 : i64, tpu.core_type = #tpu.core_type<tc>, window_params = [{transform_indices = @transform_0, window_bounds = array<i64: 2, 16, 128>}, {pipeline_mode = #tpu.pipeline_mode<synchronous>, transform_indices = @transform_1, window_bounds = array<i64: 128, 128>}, {transform_indices = @transform_2, window_bounds = array<i64: 16, 128>}]} {
    %c0 = arith.constant 0 : index
    %c0_0 = arith.constant 0 : index
    %c0_1 = arith.constant 0 : index
    %0 = vector.load %arg1[%c0, %c0_0, %c0_1] : memref<2x16x128xf32, #tpu.memory_space<vmem>>, vector<2x16x128xf32>
    %1 = vector.shape_cast %0 : vector<2x16x128xf32> to vector<32x128xf32>
    %c0_2 = arith.constant 0 : index
    %c0_3 = arith.constant 0 : index
    %2 = vector.load %arg2[%c0_2, %c0_3] : memref<128x128xf32, #tpu.memory_space<vmem>>, vector<128x128xf32>
    %cst = arith.constant dense<0.000000e+00> : vector<32x128xf32>
    %3 = tpu.matmul %1, %2, %cst {dimension_numbers = #tpu.dot_dimension_numbers<[1], [0], [0], [1], [0, 0, 1, 1], [], []>} : vector<32x128xf32>, vector<128x128xf32>, vector<32x128xf32> -> vector<32x128xf32>
    %4 = vector.extract_strided_slice %1 {offsets = [0, 0], sizes = [16, 128], strides = [1, 1]} : vector<32x128xf32> to vector<16x128xf32>
    %5 = vector.extract_strided_slice %1 {offsets = [16, 0], sizes = [16, 128], strides = [1, 1]} : vector<32x128xf32> to vector<16x128xf32>
    %6 = vector.extract_strided_slice %3 {offsets = [0, 0], sizes = [16, 128], strides = [1, 1]} : vector<32x128xf32> to vector<16x128xf32>
    %7 = vector.extract_strided_slice %3 {offsets = [16, 0], sizes = [16, 128], strides = [1, 1]} : vector<32x128xf32> to vector<16x128xf32>
    %8 = arith.subf %6, %7 : vector<16x128xf32>
    %9 = math.absf %8 : vector<16x128xf32>
    %cst_4 = arith.constant 0.000000e+00 : f32
    %10 = vector.broadcast %cst_4 : f32 to vector<16x128xf32>
    %11 = arith.subf %10, %9 : vector<16x128xf32>
    %12 = math.exp %11 : vector<16x128xf32>
    %cst_5 = arith.constant 1.000000e+00 : f32
    %13 = vector.broadcast %cst_5 : f32 to vector<16x128xf32>
    %14 = arith.addf %13, %12 : vector<16x128xf32>
    %15 = tpu.reciprocal %14 : vector<16x128xf32> -> vector<16x128xf32>
    %16 = arith.mulf %12, %15 : vector<16x128xf32>
    %cst_6 = arith.constant 0.000000e+00 : f32
    %17 = vector.broadcast %cst_6 : f32 to vector<16x128xf32>
    %18 = arith.cmpf oge, %8, %17 : vector<16x128xf32>
    %cst_7 = arith.constant 1.000000e+00 : f32
    %19 = vector.broadcast %cst_7 : f32 to vector<16x128xf32>
    %20 = arith.subf %19, %16 : vector<16x128xf32>
    %21 = arith.select %18, %20, %16 : vector<16x128xi1>, vector<16x128xf32>
    %22 = arith.mulf %21, %4 : vector<16x128xf32>
    %cst_8 = arith.constant 1.000000e+00 : f32
    %23 = vector.broadcast %cst_8 : f32 to vector<16x128xf32>
    %24 = arith.subf %23, %21 : vector<16x128xf32>
    %25 = arith.mulf %24, %5 : vector<16x128xf32>
    %26 = arith.addf %22, %25 : vector<16x128xf32>
    %c0_9 = arith.constant 0 : index
    %c0_10 = arith.constant 0 : index
    %27 = vector.load %arg3[%c0_9, %c0_10] : memref<16x128xf32, #tpu.memory_space<vmem>>, vector<16x128xf32>
    tpu.vector_store %arg3[%c0_9, %c0_10], %26 {strides = array<i32>} : memref<16x128xf32, #tpu.memory_space<vmem>>, vector<16x128xf32>,
    return
  }
  func.func @transform_0(%arg0: i32) -> (i32, i32, i32) {
    %c0_i32 = arith.constant 0 : i32
    %c0_i32_0 = arith.constant 0 : i32
    %c0_i32_1 = arith.constant 0 : i32
    return %c0_i32, %arg0, %c0_i32_0 : i32, i32, i32
  }
  func.func @transform_1(%arg0: i32) -> (i32, i32) {
    %c0_i32 = arith.constant 0 : i32
    %c0_i32_0 = arith.constant 0 : i32
    %c0_i32_1 = arith.constant 0 : i32
    return %c0_i32, %c0_i32_0 : i32, i32
  }
  func.func @transform_2(%arg0: i32) -> (i32, i32) {
    %c0_i32 = arith.constant 0 : i32
    %c0_i32_0 = arith.constant 0 : i32
    return %arg0, %c0_i32 : i32, i32
  }
}

</mosaic_0001>

<bundles_post_ra>
// kernel: tpu_custom_call.1
= control target key start
LH: loop header
LB: loop body
LE: loop exit
PB: predicated region body
PF: predicated region fallthrough
CT: control target
= control target key end

     0   :  { %7 = vsyncpa [#allocation3], 0  ;;  %s364_s0 = inlined_call_operand.hbm [shape: f32[2,16,128], index: 0, kind: input, shape index: {}]   ;;  %s365_s1 = inlined_call_operand.hbm [shape: f32[128,128], index: 1, kind: input, shape index: {}]   ;;  %s366_s2 = inlined_call_operand.hbm [shape: f32[16,128], index: 2, kind: output, shape index: {}]  }
   0x1   :  { %8 = vsyncpa [#allocation6], 0 }
   0x2   :  { %9 = vsyncpa [#allocation4], 0  ;;  %s14_s11 = sshll.u32 %s364_s0, 4  ;;  %s310_s12 = smov [#allocation2]   ;;  %s15_s11 = int_to_ptr.hbm [resolvable:$true] %s14_s11 }
   0x3   :  { %s16_s13 = sshll.u32 %s310_s12, 4  ;;  %s27_s16 = sshll.u32 %s365_s1, 4  ;;  %s17_s13 = int_to_ptr.vmem [resolvable:$true] %s16_s13  ;;  %s28_s16 = int_to_ptr.hbm [resolvable:$true] %s27_s16 }
   0x4   :  { %s311_s17 = smov 128   ;;  %s312_s18 = smov 8  }
   0x5   :  { %22 = dma.hbm_to_vmem [thread:$0]  %s15_s11, 512, %s17_s13, [#allocation3], %s311_s17, %s311_s17, %s312_s18  }
   0x6   :  { %s313_s19 = smov [#allocation5]  }
   0x7   :  { %s29_s20 = sshll.u32 %s313_s19, 4  ;;  %s30_s20 = int_to_ptr.vmem [resolvable:$true] %s29_s20 }
   0x8   :  { %35 = dma.hbm_to_vmem [thread:$0]  %s28_s16, 2048, %s30_s20, [#allocation6], %s311_s17, %s311_s17, %s312_s18  }
   0x9   :  { %304 = dma.done.wait [#allocation3], 512  }
   0xa   :  { %305 = vsyncadd [#allocation3], 4294966784 }
   0xb   :  { %306 = dma.done.wait [#allocation6], 2048  }
   0xc   :  { %307 = vsyncadd [#allocation6], 4294965248  ;;  %v63_v0 = vld [vmem:[#allocation5 + $0x78] sm:$0xff]  ;;  %v62_v1 = vld [vmem:[#allocation5 + $0x70] sm:$0xff]  ;;  %s314_s0 = smov [#allocation7]   ;;  %s157_s23 = sshll.u32 %s366_s2, 4  ;;  %s158_s23 = int_to_ptr.hbm [resolvable:$true] %s157_s23 }
   0xd   :  { %172 = vmatpush.msra.mxu2 %v63_v0  ;;  %173 = vmatpush.msra.mxu3 %v63_v0  ;;  %v61_v2 = vld [vmem:[#allocation5 + $0x68] sm:$0xff]  ;;  %v60_v3 = vld [vmem:[#allocation5 + $0x60] sm:$0xff]  ;;  %v59_v4 = vld [vmem:[#allocation5 + $0x58] sm:$0xff]  ;;  %s155_s1 = sshll.u32 %s314_s0, 4  ;;  %s156_s1 = int_to_ptr.vmem [resolvable:$true] %s155_s1 }
   0xe   :  { %64 = vmatpush.msra.mxu0 %v63_v0  ;;  %171 = vmatpush.msra.mxu1 %v63_v0  ;;  %v58_v5 = vld [vmem:[#allocation5 + $0x50] sm:$0xff]  ;;  %v57_v6 = vld [vmem:[#allocation5 + $0x48] sm:$0xff]  ;;  %v56_v7 = vld [vmem:[#allocation5 + $0x40] sm:$0xff] }
   0xf   :  { %175 = vmatpush.msra.mxu2 %v62_v1  ;;  %176 = vmatpush.msra.mxu3 %v62_v1  ;;  %v55_v8 = vld [vmem:[#allocation5 + $0x38] sm:$0xff]  ;;  %v54_v9 = vld [vmem:[#allocation5 + $0x30] sm:$0xff]  ;;  %v53_v10 = vld [vmem:[#allocation5 + $0x28] sm:$0xff] }
  0x10   :  { %65 = vmatpush.msra.mxu0 %v62_v1  ;;  %174 = vmatpush.msra.mxu1 %v62_v1  ;;  %v52_v11 = vld [vmem:[#allocation5 + $0x20] sm:$0xff]  ;;  %v51_v12 = vld [vmem:[#allocation5 + $0x18] sm:$0xff]  ;;  %v50_v13 = vld [vmem:[#allocation5 + $0x10] sm:$0xff] }
  0x11   :  { %178 = vmatpush.msra.mxu2 %v61_v2  ;;  %179 = vmatpush.msra.mxu3 %v61_v2  ;;  %v49_v14 = vld [vmem:[#allocation5 + $0x8] sm:$0xff]  ;;  %v48_v15 = vld [vmem:[#allocation5] sm:$0xff]  ;;  %v342_v16 = vld [vmem:[#allocation2 + $0x10] sm:$0xff] }
  0x12   :  { %66 = vmatpush.msra.mxu0 %v61_v2  ;;  %177 = vmatpush.msra.mxu1 %v61_v2  ;;  %v344_v17 = vld [vmem:[#allocation2 + $0x18] sm:$0xff]  ;;  %v346_v18 = vld [vmem:[#allocation2] sm:$0xff]  ;;  %v348_v19 = vld [vmem:[#allocation2 + $0x8] sm:$0xff] }
  0x13   :  { %181 = vmatpush.msra.mxu2 %v60_v3  ;;  %182 = vmatpush.msra.mxu3 %v60_v3 }
  0x14   :  { %67 = vmatpush.msra.mxu0 %v60_v3  ;;  %180 = vmatpush.msra.mxu1 %v60_v3 }
  0x15   :  { %184 = vmatpush.msra.mxu2 %v59_v4  ;;  %185 = vmatpush.msra.mxu3 %v59_v4 }
  0x16   :  { %68 = vmatpush.msra.mxu0 %v59_v4  ;;  %183 = vmatpush.msra.mxu1 %v59_v4 }
  0x17   :  { %187 = vmatpush.msra.mxu2 %v58_v5  ;;  %188 = vmatpush.msra.mxu3 %v58_v5 }
  0x18   :  { %69 = vmatpush.msra.mxu0 %v58_v5  ;;  %186 = vmatpush.msra.mxu1 %v58_v5 }
  0x19   :  { %190 = vmatpush.msra.mxu2 %v57_v6  ;;  %191 = vmatpush.msra.mxu3 %v57_v6 }
  0x1a   :  { %70 = vmatpush.msra.mxu0 %v57_v6  ;;  %189 = vmatpush.msra.mxu1 %v57_v6 }
  0x1b   :  { %193 = vmatpush.msra.mxu2 %v56_v7  ;;  %194 = vmatpush.msra.mxu3 %v56_v7 }
  0x1c   :  { %71 = vmatpush.msra.mxu0 %v56_v7  ;;  %192 = vmatpush.msra.mxu1 %v56_v7 }
  0x1d   :  { %196 = vmatpush.msra.mxu2 %v55_v8  ;;  %197 = vmatpush.msra.mxu3 %v55_v8 }
  0x1e   :  { %72 = vmatpush.msra.mxu0 %v55_v8  ;;  %195 = vmatpush.msra.mxu1 %v55_v8 }
  0x1f   :  { %199 = vmatpush.msra.mxu2 %v54_v9  ;;  %200 = vmatpush.msra.mxu3 %v54_v9 }
  0x20   :  { %73 = vmatpush.msra.mxu0 %v54_v9  ;;  %198 = vmatpush.msra.mxu1 %v54_v9 }
  0x21   :  { %202 = vmatpush.msra.mxu2 %v53_v10  ;;  %203 = vmatpush.msra.mxu3 %v53_v10 }
  0x22   :  { %74 = vmatpush.msra.mxu0 %v53_v10  ;;  %201 = vmatpush.msra.mxu1 %v53_v10 }
  0x23   :  { %205 = vmatpush.msra.mxu2 %v52_v11  ;;  %206 = vmatpush.msra.mxu3 %v52_v11 }
  0x24   :  { %75 = vmatpush.msra.mxu0 %v52_v11  ;;  %204 = vmatpush.msra.mxu1 %v52_v11 }
  0x25   :  { %208 = vmatpush.msra.mxu2 %v51_v12  ;;  %209 = vmatpush.msra.mxu3 %v51_v12 }
  0x26   :  { %76 = vmatpush.msra.mxu0 %v51_v12  ;;  %207 = vmatpush.msra.mxu1 %v51_v12 }
  0x27   :  { %211 = vmatpush.msra.mxu2 %v50_v13  ;;  %212 = vmatpush.msra.mxu3 %v50_v13 }
  0x28   :  { %77 = vmatpush.msra.mxu0 %v50_v13  ;;  %210 = vmatpush.msra.mxu1 %v50_v13 }
  0x29   :  { %214 = vmatpush.msra.mxu2 %v49_v14  ;;  %215 = vmatpush.msra.mxu3 %v49_v14 }
  0x2a   :  { %78 = vmatpush.msra.mxu0 %v49_v14  ;;  %213 = vmatpush.msra.mxu1 %v49_v14 }
  0x2b   :  { %217 = vmatpush.msra.mxu2 %v48_v15  ;;  %218 = vmatpush.msra.mxu3 %v48_v15 }
  0x2c   :  { %86 = vmatmul.f32.vlgmr.msra.gmra.mxu2 %v342_v16  ;;  %89 = vmatmul.f32.vlgmr.msra.gmra.mxu3 %v344_v17 }
  0x2d   :  { %79 = vmatpush.msra.mxu0 %v48_v15  ;;  %216 = vmatpush.msra.mxu1 %v48_v15 }
  0x2e   :  { %80 = vmatmul.f32.vlgmr.msra.gmra.mxu0 %v346_v18  ;;  %83 = vmatmul.f32.vlgmr.msra.gmra.mxu1 %v348_v19 }
  0xab   :  { %v81_v20 = vpop.f32.mrf.mxu0  ;;  %v84_v21 = vpop.f32.mrf.mxu1 }
  0xaf   :  { %v87_v22 = vpop.f32.mrf.mxu2  ;;  %v90_v23 = vpop.f32.mrf.mxu3 }
  0xb0   :  { %v93_v24 = vsub.f32 %v81_v20, %v87_v22  ;;  %v94_v25 = vsub.f32 %v84_v21, %v90_v23 }
  0xb2   :  { %v95_v26 = vand.u32 2147483647, %v93_v24  ;;  %v96_v27 = vand.u32 2147483647, %v94_v25  ;;  %vm135_vm8 = vcmp.ge.f32.partialorder %v93_v24, 0.0  ;;  %vm136_vm9 = vcmp.ge.f32.partialorder %v94_v25, 0.0 }
  0xb4   :  { %v97_v28 = vsub.f32 0.0, %v95_v26  ;;  %v98_v29 = vsub.f32 0.0, %v96_v27 }
  0xb6   :  { %v99_v30 = vmul.f32 1.442695, %v97_v28  ;;  %v101_v31 = vmul.f32 1.442695, %v98_v29 }
  0xb8   :  { %224 = vpow2.f32 %v99_v30 }
  0xb9   :  { %226 = vpow2.f32 %v101_v31 }
  0xbe   :  { %v225_v32 = vpop.eup %224 }
  0xbf   :  { %v227_v33 = vpop.eup %226  ;;  %v103_v34 = vadd.f32 1.0, %v225_v32 }
  0xc0   :  { %v104_v35 = vadd.f32 1.0, %v227_v33 }
  0xc1   :  { %228 = vrcp.f32 %v103_v34  ;;  %v116_v41 = vand.u32 2147483648, %v103_v34  ;;  %v114_v44 = vand.u32 2147483647, %v103_v34  ;;  %vm110_vm2 = vweird.f32 %v103_v34 }
  0xc2   :  { %230 = vrcp.f32 %v104_v35  ;;  %v130_v45 = vand.u32 2147483648, %v104_v35  ;;  %v128_v47 = vand.u32 2147483647, %v104_v35  ;;  %vm124_vm4 = vweird.f32 %v104_v35 }
  0xc3   :  { %v117_v49 = vor.u32 1.1754944e-38, %v116_v41  ;;  %vm115_vm5 = vcmp.eq.f32.partialorder %v114_v44, 8.507059e+37 }
  0xc4   :  { %v131_v52 = vor.u32 1.1754944e-38, %v130_v45  ;;  %vm129_vm7 = vcmp.eq.f32.partialorder %v128_v47, 8.507059e+37 }
  0xc7   :  { %v229_v36 = vpop.eup %228 }
  0xc8   :  { %v231_v37 = vpop.eup %230  ;;  %v106_v38 = vmul.f32 %v229_v36, %v103_v34  ;;  %vm111_vm0 = vweird.f32 %v229_v36 }
  0xc9   :  { %v120_v39 = vmul.f32 %v231_v37, %v104_v35  ;;  %vm125_vm1 = vweird.f32 %v231_v37  ;;  %vm112_vm3 = vmor %vm110_vm2, %vm111_vm0 }
  0xca   :  { %v107_v40 = vsub.f32 1.0, %v106_v38  ;;  %vm126_vm6 = vmor %vm124_vm4, %vm125_vm1 }
  0xcb   :  { %v121_v42 = vsub.f32 1.0, %v120_v39 }
  0xcc   :  { %v108_v43 = vmul.f32 %v229_v36, %v107_v40 }
  0xcd   :  { %v122_v46 = vmul.f32 %v231_v37, %v121_v42 }
  0xce   :  { %v109_v48 = vadd.f32 %v229_v36, %v108_v43 }
  0xcf   :  { %v123_v50 = vadd.f32 %v231_v37, %v122_v46 }
  0xd0   :  { %v113_v51 = vsel %vm112_vm3, %v229_v36, %v109_v48 }
  0xd1   :  { %v118_v53 = vsel %vm115_vm5, %v117_v49, %v113_v51  ;;  %v127_v54 = vsel %vm126_vm6, %v231_v37, %v123_v50 }
  0xd2   :  { %v133_v55 = vmul.f32 %v225_v32, %v118_v53  ;;  %v132_v56 = vsel %vm129_vm7, %v131_v52, %v127_v54 }
  0xd3   :  { %v134_v57 = vmul.f32 %v227_v33, %v132_v56 }
  0xd4   :  { %v137_v58 = vsub.f32 1.0, %v133_v55 }
  0xd5   :  { %v138_v59 = vsub.f32 1.0, %v134_v57 }
  0xd6   :  { %v139_v60 = vsel %vm135_vm8, %v137_v58, %v133_v55 }
  0xd7   :  { %v143_v61 = vsub.f32 1.0, %v139_v60  ;;  %v140_v62 = vsel %vm136_vm9, %v138_v59, %v134_v57  ;;  %v141_v0 = vmul.f32 %v139_v60, %v346_v18 }
  0xd8   :  { %v144_v63 = vsub.f32 1.0, %v140_v62  ;;  %v142_v2 = vmul.f32 %v140_v62, %v348_v19 }
  0xd9   :  { %v145_v1 = vmul.f32 %v143_v61, %v342_v16 }
  0xda   :  { %v146_v3 = vmul.f32 %v144_v63, %v344_v17 }
  0xdb   :  { %v147_v4 = vadd.f32 %v145_v1, %v141_v0 }
  0xdc   :  { %v148_v5 = vadd.f32 %v146_v3, %v142_v2 }
  0xdd   :  { %149 = vst [vmem:[#allocation7] sm:$0xff] %v147_v4 }
  0xde   :  { %150 = vst [vmem:[#allocation7 + $0x8] sm:$0xff] %v148_v5 }
  0xdf   :  { %163 = dma.vmem_to_hbm [thread:$0]  %s156_s1, 256, %s158_s23, [#allocation4], %s311_s17, %s311_s17, %s312_s18  }
  0xe0   :  { %308 = dma.done.wait [#allocation4], 256  }
  0xe1   :  { %309 = vsyncadd [#allocation4], 4294967040 }
  0xe2   :  { %168 = vsyncpa [#allocation3], 1 }
  0xe3   :  { %169 = vsyncpa [#allocation6], 1 }
  0xe4   :  { %170 = vsyncpa [#allocation4], 1 }

</bundles_post_ra>
